<compile_context>
chip_gen: v7x
topology: tpu7x:2x2x1
jax: 0.10.0
libtpu: 0.0.40
codegen_flags: <defaults>
</compile_context>

<pallas_src>
import numpy as np
import jax
import jax.numpy as jnp
from jax import lax
from jax.experimental import pallas as pl
from jax.experimental.pallas import tpu as pltpu

# ---- problem sizes ----
N = 2                        # batch
C0, H, W = 4, 16, 16         # in_size = (C, H, W)
C1, C2 = 8, 8                # filters = [8, 8], pool_every = 2
HO, WO = H // 2, W // 2      # 8, 8 after the single 2x2 max-pool
FEAT = C2 * HO * WO          # 512 flattened conv features (torch order c,ho,wo)
HID = 32                     # hidden_dims = [32]
NUM_CLASSES = 10
CPAD = 128                   # lane-dense padded logits width
IMGS = 2                     # images per grid step (2 => grid=(1,), best for
                             # single-TC v5e/v6e; use 1 to spread over v7x's TCs)
BH = IMGS * H                # 32 activation rows per grid step
HALF = WO * C2               # 64 = even-w half of conv2's permuted lane layout


def _conv_classifier_kernel(x_ref, b1m_ref, b1_ref, b2m_ref, b2_ref,
                            w3_ref, b3_ref, w4_ref, b4_ref,
                            o_ref, feat_ref):
    # Row-validity masks for the +/-1 row (ky) taps.  Rows are n*H + h, so the
    # shifted reads must not leak across the image boundary inside the block.
    h_idx = lax.broadcasted_iota(jnp.int32, (BH, 1), 0) % H
    up_ok = (h_idx >= 1).astype(jnp.float32)        # reading row h-1 is valid
    dn_ok = (h_idx <= H - 2).astype(jnp.float32)    # reading row h+1 is valid

    def conv3x3(a, bm_ref, bias_row):
        # a: (BH, W*C_in), rows = n*H+h, lanes = w*C_in + c.
        # bm_ref[ky]: (W*C_in, W*C_out) banded matrix carrying the kx taps
        # (built host-side), so the whole conv is 3 lane-dense matmuls plus
        # two sublane rolls for the ky taps.
        am = pltpu.roll(a, shift=1, axis=0) * up_ok           # row h-1 (ky=0)
        ap = pltpu.roll(a, shift=BH - 1, axis=0) * dn_ok      # row h+1 (ky=2)
        acc = jnp.dot(am, bm_ref[0], preferred_element_type=jnp.float32)
        acc = acc + jnp.dot(a, bm_ref[1], preferred_element_type=jnp.float32)
        acc = acc + jnp.dot(ap, bm_ref[2], preferred_element_type=jnp.float32)
        return jnp.maximum(acc + bias_row, 0.0)

    x = x_ref[...]                                            # (32, 64)
    h1 = conv3x3(x, b1m_ref, b1_ref[...])    # (32, 128), lane = w*C1 + c
    h2 = conv3x3(h1, b2m_ref, b2_ref[...])   # (32, 128), lane = (w%2)*64 + (w//2)*C2 + c

    # MaxPool2d(2): h-pairs via one sublane roll, w-pairs via even/odd lane
    # halves (conv2's lane permutation makes the two halves line up).
    mr = jnp.maximum(h2, pltpu.roll(h2, shift=BH - 1, axis=0))
    mp = jnp.maximum(mr[:, :HALF], mr[:, HALF:])              # (32, 64), lane = wo*C2 + c

    # Flatten pooled features (even rows only) into a (IMGS, 512) block so FC1
    # is a single matmul.  16 tiny static stores; W3 rows are permuted
    # host-side to this (ho, wo, c) ordering.
    for n in range(IMGS):
        for ho in range(HO):
            feat_ref[n:n + 1, ho * HALF:(ho + 1) * HALF] = (
                mp[n * H + 2 * ho:n * H + 2 * ho + 1, :])

    # Classifier: Linear(512->32)+ReLU, then Linear(32->128 padded).
    z1 = jnp.dot(feat_ref[...], w3_ref[...],
                 preferred_element_type=jnp.float32) + b3_ref[...]
    z1 = jnp.maximum(z1, 0.0)                                  # (IMGS, 32)
    logits = jnp.dot(z1, w4_ref[...],
                     preferred_element_type=jnp.float32) + b4_ref[...]
    o_ref[...] = logits                                        # lane-dense (IMGS, 128) store


@jax.jit
def conv_classifier_forward(x_nchw, kp):
    (b1mats, b1lane, b2mats, b2lane, w3p, b3r, w4p, b4p) = kp
    # rows = n*H + h, lanes = w*C0 + ci
    x_rows = jnp.transpose(x_nchw, (0, 2, 3, 1)).reshape(N * H, W * C0)
    x_rows = x_rows.astype(jnp.float32)

    grid_spec = pltpu.PrefetchScalarGridSpec(
        num_scalar_prefetch=0,
        grid=(N // IMGS,),
        in_specs=[
            pl.BlockSpec((IMGS * H, W * C0), lambda i: (i, 0)),      # x block
            pl.BlockSpec((3, W * C0, W * C1), lambda i: (0, 0, 0)),  # conv1 banded mats
            pl.BlockSpec((1, W * C1), lambda i: (0, 0)),             # conv1 bias (per lane)
            pl.BlockSpec((3, W * C1, W * C2), lambda i: (0, 0, 0)),  # conv2 banded mats
            pl.BlockSpec((1, W * C2), lambda i: (0, 0)),             # conv2 bias (per lane)
            pl.BlockSpec((FEAT, HID), lambda i: (0, 0)),             # fc1 (rows permuted)
            pl.BlockSpec((1, HID), lambda i: (0, 0)),                # fc1 bias
            pl.BlockSpec((HID, CPAD), lambda i: (0, 0)),             # fc2 (lane padded)
            pl.BlockSpec((1, CPAD), lambda i: (0, 0)),               # fc2 bias (padded)
        ],
        out_specs=pl.BlockSpec((IMGS, CPAD), lambda i: (i, 0)),
        scratch_shapes=[pltpu.VMEM((IMGS, FEAT), jnp.float32)],
    )
    out = pl.pallas_call(
        _conv_classifier_kernel,
        out_shape=jax.ShapeDtypeStruct((N, CPAD), jnp.float32),
        grid_spec=grid_spec,
        compiler_params=pltpu.CompilerParams(
            dimension_semantics=("parallel",)),
    )(x_rows, b1mats, b1lane, b2mats, b2lane, w3p, b3r, w4p, b4p)
    return out[:, :NUM_CLASSES]


def _build_band(wconv, c_in, c_out, out_base):
    """Fold the kx taps of a 3x3 HWIO conv weight into 3 banded matrices.

    Returns mats[ky] of shape (W*c_in, W*c_out) such that, for activations laid
    out as rows=h / lanes=w*c_in+ci, the conv is sum_ky rowshift(a, ky-1) @ mats[ky].
    `out_base(w_out)` picks the output-lane block, allowing a permuted output
    lane order (used to make the max-pool a half-split max).
    """
    mats = []
    for ky in range(3):
        bk = np.zeros((W * c_in, W * c_out), np.float32)
        for w_out in range(W):
            ob = out_base(w_out)
            for kx in range(3):
                w_in = w_out + kx - 1
                if 0 <= w_in < W:
                    bk[w_in * c_in:(w_in + 1) * c_in, ob:ob + c_out] = wconv[ky, kx]
        mats.append(bk)
    return np.stack(mats)


def make_params(key):
    ks = jax.random.split(key, 8)
    w1 = 0.1 * jax.random.normal(ks[0], (3, 3, C0, C1), jnp.float32)   # HWIO
    b1 = 0.1 * jax.random.normal(ks[1], (C1,), jnp.float32)
    w2 = 0.1 * jax.random.normal(ks[2], (3, 3, C1, C2), jnp.float32)
    b2 = 0.1 * jax.random.normal(ks[3], (C2,), jnp.float32)
    # fc1 rows follow the PyTorch flatten order of an NCHW conv output: (c, ho, wo)
    wfc1 = 0.05 * jax.random.normal(ks[4], (FEAT, HID), jnp.float32)
    bfc1 = 0.05 * jax.random.normal(ks[5], (HID,), jnp.float32)
    wfc2 = 0.1 * jax.random.normal(ks[6], (HID, NUM_CLASSES), jnp.float32)
    bfc2 = 0.1 * jax.random.normal(ks[7], (NUM_CLASSES,), jnp.float32)
    raw = dict(w1=w1, b1=b1, w2=w2, b2=b2,
               wfc1=wfc1, bfc1=bfc1, wfc2=wfc2, bfc2=bfc2)

    # ---- kernel-layout parameters ----
    # conv1 output lanes: natural order  w*C1 + c
    b1mats = jnp.asarray(_build_band(np.asarray(w1), C0, C1,
                                     lambda w: w * C1))
    # conv2 output lanes: evens-first order (w%2)*64 + (w//2)*C2 + c, so the
    # 2x2 max-pool's w-pairs become the two 64-lane halves.
    b2mats = jnp.asarray(_build_band(np.asarray(w2), C1, C2,
                                     lambda w: (w % 2) * HALF + (w // 2) * C2))
    b1lane = jnp.tile(b1, (W,)).reshape(1, W * C1)   # lane -> b1[lane % C1]
    b2lane = jnp.tile(b2, (W,)).reshape(1, W * C2)   # same channel-in-lane rule
    # fc1: permute rows from torch order (c, ho, wo) to kernel order (ho, wo, c)
    w3p = wfc1.reshape(C2, HO, WO, HID).transpose(1, 2, 0, 3).reshape(FEAT, HID)
    b3r = bfc1.reshape(1, HID)
    w4p = jnp.pad(wfc2, ((0, 0), (0, CPAD - NUM_CLASSES)))
    b4p = jnp.pad(bfc2, (0, CPAD - NUM_CLASSES)).reshape(1, CPAD)
    kp = (b1mats, b1lane, b2mats, b2lane, w3p, b3r, w4p, b4p)
    return raw, kp


def ref_forward(x_nchw, raw):
    """Pure-JAX reference of ConvClassifier.forward, NCHW in / (N, classes) out."""
    prec = lax.Precision.HIGHEST
    x = jnp.transpose(x_nchw, (0, 2, 3, 1)).astype(jnp.float32)
    dn = ('NHWC', 'HWIO', 'NHWC')
    h = lax.conv_general_dilated(x, raw['w1'], (1, 1), 'SAME',
                                 dimension_numbers=dn, precision=prec) + raw['b1']
    h = jax.nn.relu(h)
    h = lax.conv_general_dilated(h, raw['w2'], (1, 1), 'SAME',
                                 dimension_numbers=dn, precision=prec) + raw['b2']
    h = jax.nn.relu(h)
    h = lax.reduce_window(h, -jnp.inf, lax.max,
                          (1, 2, 2, 1), (1, 2, 2, 1), 'VALID')      # (N,HO,WO,C2)
    feat = jnp.transpose(h, (0, 3, 1, 2)).reshape(N, FEAT)          # torch .view order
    z = jax.nn.relu(jnp.dot(feat, raw['wfc1'], precision=prec) + raw['bfc1'])
    return jnp.dot(z, raw['wfc2'], precision=prec) + raw['bfc2']


if __name__ == "__main__":
    key = jax.random.PRNGKey(0)
    kx, kp_key = jax.random.split(key)
    x = jax.random.normal(kx, (N, C0, H, W), jnp.float32)   # NCHW like PyTorch

    raw, kp = make_params(kp_key)

    out = jax.block_until_ready(conv_classifier_forward(x, kp))
    ref = ref_forward(x, raw)
    assert out.shape == ref.shape == (N, NUM_CLASSES), (out.shape, ref.shape)
    max_err = float(jnp.max(jnp.abs(out - ref)))
    # Tightened from 5e-2 (review): far below any layout/permutation-bug signal
    # (~1e-1), with headroom for MXU rounding along the 3-matmul-deep chain.
    assert max_err < 5e-3, f"max abs error {max_err}"

    print("KERNEL_OK")
</pallas_src>

<mosaic_0001>
module attributes {stable_mosaic.version = 11 : i64} {
  func.func @_conv_classifier_kernel(%arg0: i32, %arg1: memref<32x64xf32, #tpu.memory_space<vmem>>, %arg2: memref<3x64x128xf32, #tpu.memory_space<vmem>>, %arg3: memref<1x128xf32, #tpu.memory_space<vmem>>, %arg4: memref<3x128x128xf32, #tpu.memory_space<vmem>>, %arg5: memref<1x128xf32, #tpu.memory_space<vmem>>, %arg6: memref<512x32xf32, #tpu.memory_space<vmem>>, %arg7: memref<1x32xf32, #tpu.memory_space<vmem>>, %arg8: memref<32x128xf32, #tpu.memory_space<vmem>>, %arg9: memref<1x128xf32, #tpu.memory_space<vmem>>, %arg10: memref<2x128xf32, #tpu.memory_space<vmem>>, %arg11: memref<2x512xf32, #tpu.memory_space<vmem>>) attributes {dimension_semantics = [#tpu.dimension_semantics<parallel>], iteration_bounds = array<i64: 1>, scalar_prefetch = 0 : i64, scratch_operands = 1 : i64, tpu.core_type = #tpu.core_type<tc>, window_params = [{transform_indices = @transform_0, window_bounds = array<i64: 32, 64>}, {pipeline_mode = #tpu.pipeline_mode<synchronous>, transform_indices = @transform_1, window_bounds = array<i64: 3, 64, 128>}, {pipeline_mode = #tpu.pipeline_mode<synchronous>, transform_indices = @transform_2, window_bounds = array<i64: 1, 128>}, {pipeline_mode = #tpu.pipeline_mode<synchronous>, transform_indices = @transform_3, window_bounds = array<i64: 3, 128, 128>}, {pipeline_mode = #tpu.pipeline_mode<synchronous>, transform_indices = @transform_4, window_bounds = array<i64: 1, 128>}, {pipeline_mode = #tpu.pipeline_mode<synchronous>, transform_indices = @transform_5, window_bounds = array<i64: 512, 32>}, {pipeline_mode = #tpu.pipeline_mode<synchronous>, transform_indices = @transform_6, window_bounds = array<i64: 1, 32>}, {pipeline_mode = #tpu.pipeline_mode<synchronous>, transform_indices = @transform_7, window_bounds = array<i64: 32, 128>}, {pipeline_mode = #tpu.pipeline_mode<synchronous>, transform_indices = @transform_8, window_bounds = array<i64: 1, 128>}, {transform_indices = @transform_9, window_bounds = array<i64: 2, 128>}]} {
    %0 = tpu.iota {dimensions = array<i32: 0>} : vector<32x1xi32>
    %c16_i32 = arith.constant 16 : i32
    %c0_i32 = arith.constant 0 : i32
    %1 = arith.cmpi eq, %c16_i32, %c0_i32 : i32
    %c1_i32 = arith.constant 1 : i32
    %2 = arith.select %1, %c1_i32, %c16_i32 : i32
    %3 = vector.broadcast %2 : i32 to vector<32x1xi32>
    %4 = arith.remsi %0, %3 : vector<32x1xi32>
    %c0_i32_0 = arith.constant 0 : i32
    %5 = vector.broadcast %c0_i32_0 : i32 to vector<32x1xi32>
    %6 = arith.cmpi ne, %4, %5 : vector<32x1xi32>
    %c0_i32_1 = arith.constant 0 : i32
    %7 = vector.broadcast %c0_i32_1 : i32 to vector<32x1xi32>
    %8 = arith.cmpi slt, %4, %7 : vector<32x1xi32>
    %c0_i32_2 = arith.constant 0 : i32
    %9 = arith.cmpi slt, %2, %c0_i32_2 : i32
    %10 = vector.broadcast %9 : i1 to vector<32x1xi1>
    %11 = vector.broadcast %10 : vector<32x1xi1> to vector<32x1xi1>
    %12 = arith.xori %8, %11 : vector<32x1xi1>
    %13 = arith.andi %12, %6 : vector<32x1xi1>
    %14 = vector.broadcast %2 : i32 to vector<32x1xi32>
    %15 = arith.addi %4, %14 : vector<32x1xi32>
    %16 = arith.select %13, %15, %4 : vector<32x1xi1>, vector<32x1xi32>
    %c1_i32_3 = arith.constant 1 : i32
    %17 = vector.broadcast %c1_i32_3 : i32 to vector<32x1xi32>
    %18 = arith.cmpi sge, %16, %17 : vector<32x1xi32>
    %19 = arith.extui %18 : vector<32x1xi1> to vector<32x1xi32>
    %20 = arith.sitofp %19 : vector<32x1xi32> to vector<32x1xf32>
    %c14_i32 = arith.constant 14 : i32
    %21 = vector.broadcast %c14_i32 : i32 to vector<32x1xi32>
    %22 = arith.cmpi sle, %16, %21 : vector<32x1xi32>
    %23 = arith.extui %22 : vector<32x1xi1> to vector<32x1xi32>
    %24 = arith.sitofp %23 : vector<32x1xi32> to vector<32x1xf32>
    %c0 = arith.constant 0 : index
    %c0_4 = arith.constant 0 : index
    %25 = vector.load %arg1[%c0, %c0_4] : memref<32x64xf32, #tpu.memory_space<vmem>>, vector<32x64xf32>
    %c0_5 = arith.constant 0 : index
    %c0_6 = arith.constant 0 : index
    %26 = vector.load %arg3[%c0_5, %c0_6] : memref<1x128xf32, #tpu.memory_space<vmem>>, vector<1x128xf32>
    %c1_i32_7 = arith.constant 1 : i32
    %27 = tpu.dynamic_rotate %25 by %c1_i32_7 dim 0 : vector<32x64xf32>, i32 -> vector<32x64xf32>
    %28 = vector.broadcast %20 : vector<32x1xf32> to vector<32x64xf32>
    %29 = arith.mulf %27, %28 : vector<32x64xf32>
    %c31_i32 = arith.constant 31 : i32
    %30 = tpu.dynamic_rotate %25 by %c31_i32 dim 0 : vector<32x64xf32>, i32 -> vector<32x64xf32>
    %31 = vector.broadcast %24 : vector<32x1xf32> to vector<32x64xf32>
    %32 = arith.mulf %30, %31 : vector<32x64xf32>
    %c0_8 = arith.constant 0 : index
    %c0_9 = arith.constant 0 : index
    %c0_10 = arith.constant 0 : index
    %33 = vector.load %arg2[%c0_8, %c0_9, %c0_10] : memref<3x64x128xf32, #tpu.memory_space<vmem>>, vector<1x64x128xf32>
    %34 = vector.shape_cast %33 : vector<1x64x128xf32> to vector<64x128xf32>
    %cst = arith.constant dense<0.000000e+00> : vector<32x128xf32>
    %35 = tpu.matmul %29, %34, %cst {dimension_numbers = #tpu.dot_dimension_numbers<[1], [0], [0], [1], [0, 0, 1, 1], [], []>} : vector<32x64xf32>, vector<64x128xf32>, vector<32x128xf32> -> vector<32x128xf32>
    %c1 = arith.constant 1 : index
    %c0_11 = arith.constant 0 : index
    %c0_12 = arith.constant 0 : index
    %36 = vector.load %arg2[%c1, %c0_11, %c0_12] : memref<3x64x128xf32, #tpu.memory_space<vmem>>, vector<1x64x128xf32>
    %37 = vector.shape_cast %36 : vector<1x64x128xf32> to vector<64x128xf32>
    %cst_13 = arith.constant dense<0.000000e+00> : vector<32x128xf32>
    %38 = tpu.matmul %25, %37, %cst_13 {dimension_numbers = #tpu.dot_dimension_numbers<[1], [0], [0], [1], [0, 0, 1, 1], [], []>} : vector<32x64xf32>, vector<64x128xf32>, vector<32x128xf32> -> vector<32x128xf32>
    %39 = arith.addf %35, %38 : vector<32x128xf32>
    %c2 = arith.constant 2 : index
    %c0_14 = arith.constant 0 : index
    %c0_15 = arith.constant 0 : index
    %40 = vector.load %arg2[%c2, %c0_14, %c0_15] : memref<3x64x128xf32, #tpu.memory_space<vmem>>, vector<1x64x128xf32>
    %41 = vector.shape_cast %40 : vector<1x64x128xf32> to vector<64x128xf32>
    %cst_16 = arith.constant dense<0.000000e+00> : vector<32x128xf32>
    %42 = tpu.matmul %32, %41, %cst_16 {dimension_numbers = #tpu.dot_dimension_numbers<[1], [0], [0], [1], [0, 0, 1, 1], [], []>} : vector<32x64xf32>, vector<64x128xf32>, vector<32x128xf32> -> vector<32x128xf32>
    %43 = arith.addf %39, %42 : vector<32x128xf32>
    %44 = vector.broadcast %26 : vector<1x128xf32> to vector<32x128xf32>
    %45 = arith.addf %43, %44 : vector<32x128xf32>
    %cst_17 = arith.constant 0.000000e+00 : f32
    %46 = vector.broadcast %cst_17 : f32 to vector<32x128xf32>
    %47 = arith.maximumf %45, %46 : vector<32x128xf32>
    %c0_18 = arith.constant 0 : index
    %c0_19 = arith.constant 0 : index
    %48 = vector.load %arg5[%c0_18, %c0_19] : memref<1x128xf32, #tpu.memory_space<vmem>>, vector<1x128xf32>
    %c1_i32_20 = arith.constant 1 : i32
    %49 = tpu.dynamic_rotate %47 by %c1_i32_20 dim 0 : vector<32x128xf32>, i32 -> vector<32x128xf32>
    %50 = vector.broadcast %20 : vector<32x1xf32> to vector<32x128xf32>
    %51 = arith.mulf %49, %50 : vector<32x128xf32>
    %c31_i32_21 = arith.constant 31 : i32
    %52 = tpu.dynamic_rotate %47 by %c31_i32_21 dim 0 : vector<32x128xf32>, i32 -> vector<32x128xf32>
    %53 = vector.broadcast %24 : vector<32x1xf32> to vector<32x128xf32>
    %54 = arith.mulf %52, %53 : vector<32x128xf32>
    %c0_22 = arith.constant 0 : index
    %c0_23 = arith.constant 0 : index
    %c0_24 = arith.constant 0 : index
    %55 = vector.load %arg4[%c0_22, %c0_23, %c0_24] : memref<3x128x128xf32, #tpu.memory_space<vmem>>, vector<1x128x128xf32>
    %56 = vector.shape_cast %55 : vector<1x128x128xf32> to vector<128x128xf32>
    %cst_25 = arith.constant dense<0.000000e+00> : vector<32x128xf32>
    %57 = tpu.matmul %51, %56, %cst_25 {dimension_numbers = #tpu.dot_dimension_numbers<[1], [0], [0], [1], [0, 0, 1, 1], [], []>} : vector<32x128xf32>, vector<128x128xf32>, vector<32x128xf32> -> vector<32x128xf32>
    %c1_26 = arith.constant 1 : index
    %c0_27 = arith.constant 0 : index
    %c0_28 = arith.constant 0 : index
    %58 = vector.load %arg4[%c1_26, %c0_27, %c0_28] : memref<3x128x128xf32, #tpu.memory_space<vmem>>, vector<1x128x128xf32>
    %59 = vector.shape_cast %58 : vector<1x128x128xf32> to vector<128x128xf32>
    %cst_29 = arith.constant dense<0.000000e+00> : vector<32x128xf32>
    %60 = tpu.matmul %47, %59, %cst_29 {dimension_numbers = #tpu.dot_dimension_numbers<[1], [0], [0], [1], [0, 0, 1, 1], [], []>} : vector<32x128xf32>, vector<128x128xf32>, vector<32x128xf32> -> vector<32x128xf32>
    %61 = arith.addf %57, %60 : vector<32x128xf32>
    %c2_30 = arith.constant 2 : index
    %c0_31 = arith.constant 0 : index
    %c0_32 = arith.constant 0 : index
    %62 = vector.load %arg4[%c2_30, %c0_31, %c0_32] : memref<3x128x128xf32, #tpu.memory_space<vmem>>, vector<1x128x128xf32>
    %63 = vector.shape_cast %62 : vector<1x128x128xf32> to vector<128x128xf32>
    %cst_33 = arith.constant dense<0.000000e+00> : vector<32x128xf32>
    %64 = tpu.matmul %54, %63, %cst_33 {dimension_numbers = #tpu.dot_dimension_numbers<[1], [0], [0], [1], [0, 0, 1, 1], [], []>} : vector<32x128xf32>, vector<128x128xf32>, vector<32x128xf32> -> vector<32x128xf32>
    %65 = arith.addf %61, %64 : vector<32x128xf32>
    %66 = vector.broadcast %48 : vector<1x128xf32> to vector<32x128xf32>
    %67 = arith.addf %65, %66 : vector<32x128xf32>
    %cst_34 = arith.constant 0.000000e+00 : f32
    %68 = vector.broadcast %cst_34 : f32 to vector<32x128xf32>
    %69 = arith.maximumf %67, %68 : vector<32x128xf32>
    %c31_i32_35 = arith.constant 31 : i32
    %70 = tpu.dynamic_rotate %69 by %c31_i32_35 dim 0 : vector<32x128xf32>, i32 -> vector<32x128xf32>
    %71 = arith.maximumf %69, %70 : vector<32x128xf32>
    %72 = vector.extract_strided_slice %71 {offsets = [0, 0], sizes = [32, 64], strides = [1, 1]} : vector<32x128xf32> to vector<32x64xf32>
    %73 = vector.extract_strided_slice %71 {offsets = [0, 64], sizes = [32, 64], strides = [1, 1]} : vector<32x128xf32> to vector<32x64xf32>
    %74 = arith.maximumf %72, %73 : vector<32x64xf32>
    %75 = vector.extract_strided_slice %74 {offsets = [0, 0], sizes = [1, 64], strides = [1, 1]} : vector<32x64xf32> to vector<1x64xf32>
    %c0_36 = arith.constant 0 : index
    %c0_37 = arith.constant 0 : index
    %76 = vector.load %arg11[%c0_36, %c0_37] : memref<2x512xf32, #tpu.memory_space<vmem>>, vector<1x64xf32>
    tpu.vector_store %arg11[%c0_36, %c0_37], %75 {strides = array<i32>} : memref<2x512xf32, #tpu.memory_space<vmem>>, vector<1x64xf32>,
    %77 = vector.extract_strided_slice %74 {offsets = [2, 0], sizes = [1, 64], strides = [1, 1]} : vector<32x64xf32> to vector<1x64xf32>
    %c0_38 = arith.constant 0 : index
    %c64 = arith.constant 64 : index
    %78 = vector.load %arg11[%c0_38, %c64] : memref<2x512xf32, #tpu.memory_space<vmem>>, vector<1x64xf32>
    tpu.vector_store %arg11[%c0_38, %c64], %77 {strides = array<i32>} : memref<2x512xf32, #tpu.memory_space<vmem>>, vector<1x64xf32>,
    %79 = vector.extract_strided_slice %74 {offsets = [4, 0], sizes = [1, 64], strides = [1, 1]} : vector<32x64xf32> to vector<1x64xf32>
    %c0_39 = arith.constant 0 : index
    %c128 = arith.constant 128 : index
    %80 = vector.load %arg11[%c0_39, %c128] : memref<2x512xf32, #tpu.memory_space<vmem>>, vector<1x64xf32>
    tpu.vector_store %arg11[%c0_39, %c128], %79 {strides = array<i32>} : memref<2x512xf32, #tpu.memory_space<vmem>>, vector<1x64xf32>,
    %81 = vector.extract_strided_slice %74 {offsets = [6, 0], sizes = [1, 64], strides = [1, 1]} : vector<32x64xf32> to vector<1x64xf32>
    %c0_40 = arith.constant 0 : index
    %c192 = arith.constant 192 : index
    %82 = vector.load %arg11[%c0_40, %c192] : memref<2x512xf32, #tpu.memory_space<vmem>>, vector<1x64xf32>
    tpu.vector_store %arg11[%c0_40, %c192], %81 {strides = array<i32>} : memref<2x512xf32, #tpu.memory_space<vmem>>, vector<1x64xf32>,
    %83 = vector.extract_strided_slice %74 {offsets = [8, 0], sizes = [1, 64], strides = [1, 1]} : vector<32x64xf32> to vector<1x64xf32>
    %c0_41 = arith.constant 0 : index
    %c256 = arith.constant 256 : index
    %84 = vector.load %arg11[%c0_41, %c256] : memref<2x512xf32, #tpu.memory_space<vmem>>, vector<1x64xf32>
    tpu.vector_store %arg11[%c0_41, %c256], %83 {strides = array<i32>} : memref<2x512xf32, #tpu.memory_space<vmem>>, vector<1x64xf32>,
    %85 = vector.extract_strided_slice %74 {offsets = [10, 0], sizes = [1, 64], strides = [1, 1]} : vector<32x64xf32> to vector<1x64xf32>
    %c0_42 = arith.constant 0 : index
    %c320 = arith.constant 320 : index
    %86 = vector.load %arg11[%c0_42, %c320] : memref<2x512xf32, #tpu.memory_space<vmem>>, vector<1x64xf32>
    tpu.vector_store %arg11[%c0_42, %c320], %85 {strides = array<i32>} : memref<2x512xf32, #tpu.memory_space<vmem>>, vector<1x64xf32>,
    %87 = vector.extract_strided_slice %74 {offsets = [12, 0], sizes = [1, 64], strides = [1, 1]} : vector<32x64xf32> to vector<1x64xf32>
    %c0_43 = arith.constant 0 : index
    %c384 = arith.constant 384 : index
    %88 = vector.load %arg11[%c0_43, %c384] : memref<2x512xf32, #tpu.memory_space<vmem>>, vector<1x64xf32>
    tpu.vector_store %arg11[%c0_43, %c384], %87 {strides = array<i32>} : memref<2x512xf32, #tpu.memory_space<vmem>>, vector<1x64xf32>,
    %89 = vector.extract_strided_slice %74 {offsets = [14, 0], sizes = [1, 64], strides = [1, 1]} : vector<32x64xf32> to vector<1x64xf32>
    %c0_44 = arith.constant 0 : index
    %c448 = arith.constant 448 : index
    %90 = vector.load %arg11[%c0_44, %c448] : memref<2x512xf32, #tpu.memory_space<vmem>>, vector<1x64xf32>
    tpu.vector_store %arg11[%c0_44, %c448], %89 {strides = array<i32>} : memref<2x512xf32, #tpu.memory_space<vmem>>, vector<1x64xf32>,
    %91 = vector.extract_strided_slice %74 {offsets = [16, 0], sizes = [1, 64], strides = [1, 1]} : vector<32x64xf32> to vector<1x64xf32>
    %c1_45 = arith.constant 1 : index
    %c0_46 = arith.constant 0 : index
    %92 = vector.load %arg11[%c1_45, %c0_46] : memref<2x512xf32, #tpu.memory_space<vmem>>, vector<1x64xf32>
    tpu.vector_store %arg11[%c1_45, %c0_46], %91 {strides = array<i32>} : memref<2x512xf32, #tpu.memory_space<vmem>>, vector<1x64xf32>,
    %93 = vector.extract_strided_slice %74 {offsets = [18, 0], sizes = [1, 64], strides = [1, 1]} : vector<32x64xf32> to vector<1x64xf32>
    %c1_47 = arith.constant 1 : index
    %c64_48 = arith.constant 64 : index
    %94 = vector.load %arg11[%c1_47, %c64_48] : memref<2x512xf32, #tpu.memory_space<vmem>>, vector<1x64xf32>
    tpu.vector_store %arg11[%c1_47, %c64_48], %93 {strides = array<i32>} : memref<2x512xf32, #tpu.memory_space<vmem>>, vector<1x64xf32>,
    %95 = vector.extract_strided_slice %74 {offsets = [20, 0], sizes = [1, 64], strides = [1, 1]} : vector<32x64xf32> to vector<1x64xf32>
    %c1_49 = arith.constant 1 : index
    %c128_50 = arith.constant 128 : index
    %96 = vector.load %arg11[%c1_49, %c128_50] : memref<2x512xf32, #tpu.memory_space<vmem>>, vector<1x64xf32>
    tpu.vector_store %arg11[%c1_49, %c128_50], %95 {strides = array<i32>} : memref<2x512xf32, #tpu.memory_space<vmem>>, vector<1x64xf32>,
    %97 = vector.extract_strided_slice %74 {offsets = [22, 0], sizes = [1, 64], strides = [1, 1]} : vector<32x64xf32> to vector<1x64xf32>
    %c1_51 = arith.constant 1 : index
    %c192_52 = arith.constant 192 : index
    %98 = vector.load %arg11[%c1_51, %c192_52] : memref<2x512xf32, #tpu.memory_space<vmem>>, vector<1x64xf32>
    tpu.vector_store %arg11[%c1_51, %c192_52], %97 {strides = array<i32>} : memref<2x512xf32, #tpu.memory_space<vmem>>, vector<1x64xf32>,
    %99 = vector.extract_strided_slice %74 {offsets = [24, 0], sizes = [1, 64], strides = [1, 1]} : vector<32x64xf32> to vector<1x64xf32>
    %c1_53 = arith.constant 1 : index
    %c256_54 = arith.constant 256 : index
    %100 = vector.load %arg11[%c1_53, %c256_54] : memref<2x512xf32, #tpu.memory_space<vmem>>, vector<1x64xf32>
    tpu.vector_store %arg11[%c1_53, %c256_54], %99 {strides = array<i32>} : memref<2x512xf32, #tpu.memory_space<vmem>>, vector<1x64xf32>,
    %101 = vector.extract_strided_slice %74 {offsets = [26, 0], sizes = [1, 64], strides = [1, 1]} : vector<32x64xf32> to vector<1x64xf32>
    %c1_55 = arith.constant 1 : index
    %c320_56 = arith.constant 320 : index
    %102 = vector.load %arg11[%c1_55, %c320_56] : memref<2x512xf32, #tpu.memory_space<vmem>>, vector<1x64xf32>
    tpu.vector_store %arg11[%c1_55, %c320_56], %101 {strides = array<i32>} : memref<2x512xf32, #tpu.memory_space<vmem>>, vector<1x64xf32>,
    %103 = vector.extract_strided_slice %74 {offsets = [28, 0], sizes = [1, 64], strides = [1, 1]} : vector<32x64xf32> to vector<1x64xf32>
    %c1_57 = arith.constant 1 : index
    %c384_58 = arith.constant 384 : index
    %104 = vector.load %arg11[%c1_57, %c384_58] : memref<2x512xf32, #tpu.memory_space<vmem>>, vector<1x64xf32>
    tpu.vector_store %arg11[%c1_57, %c384_58], %103 {strides = array<i32>} : memref<2x512xf32, #tpu.memory_space<vmem>>, vector<1x64xf32>,
    %105 = vector.extract_strided_slice %74 {offsets = [30, 0], sizes = [1, 64], strides = [1, 1]} : vector<32x64xf32> to vector<1x64xf32>
    %c1_59 = arith.constant 1 : index
    %c448_60 = arith.constant 448 : index
    %106 = vector.load %arg11[%c1_59, %c448_60] : memref<2x512xf32, #tpu.memory_space<vmem>>, vector<1x64xf32>
    tpu.vector_store %arg11[%c1_59, %c448_60], %105 {strides = array<i32>} : memref<2x512xf32, #tpu.memory_space<vmem>>, vector<1x64xf32>,
    %c0_61 = arith.constant 0 : index
    %c0_62 = arith.constant 0 : index
    %107 = vector.load %arg11[%c0_61, %c0_62] : memref<2x512xf32, #tpu.memory_space<vmem>>, vector<2x512xf32>
    %c0_63 = arith.constant 0 : index
    %c0_64 = arith.constant 0 : index
    %108 = vector.load %arg6[%c0_63, %c0_64] : memref<512x32xf32, #tpu.memory_space<vmem>>, vector<512x32xf32>
    %cst_65 = arith.constant dense<0.000000e+00> : vector<2x32xf32>
    %109 = tpu.matmul %107, %108, %cst_65 {dimension_numbers = #tpu.dot_dimension_numbers<[1], [0], [0], [1], [0, 0, 1, 1], [], []>} : vector<2x512xf32>, vector<512x32xf32>, vector<2x32xf32> -> vector<2x32xf32>
    %c0_66 = arith.constant 0 : index
    %c0_67 = arith.constant 0 : index
    %110 = vector.load %arg7[%c0_66, %c0_67] : memref<1x32xf32, #tpu.memory_space<vmem>>, vector<1x32xf32>
    %111 = vector.broadcast %110 : vector<1x32xf32> to vector<2x32xf32>
    %112 = arith.addf %109, %111 : vector<2x32xf32>
    %cst_68 = arith.constant 0.000000e+00 : f32
    %113 = vector.broadcast %cst_68 : f32 to vector<2x32xf32>
    %114 = arith.maximumf %112, %113 : vector<2x32xf32>
    %c0_69 = arith.constant 0 : index
    %c0_70 = arith.constant 0 : index
    %115 = vector.load %arg8[%c0_69, %c0_70] : memref<32x128xf32, #tpu.memory_space<vmem>>, vector<32x128xf32>
    %cst_71 = arith.constant dense<0.000000e+00> : vector<2x128xf32>
    %116 = tpu.matmul %114, %115, %cst_71 {dimension_numbers = #tpu.dot_dimension_numbers<[1], [0], [0], [1], [0, 0, 1, 1], [], []>} : vector<2x32xf32>, vector<32x128xf32>, vector<2x128xf32> -> vector<2x128xf32>
    %c0_72 = arith.constant 0 : index
    %c0_73 = arith.constant 0 : index
    %117 = vector.load %arg9[%c0_72, %c0_73] : memref<1x128xf32, #tpu.memory_space<vmem>>, vector<1x128xf32>
    %118 = vector.broadcast %117 : vector<1x128xf32> to vector<2x128xf32>
    %119 = arith.addf %116, %118 : vector<2x128xf32>
    %c0_74 = arith.constant 0 : index
    %c0_75 = arith.constant 0 : index
    %120 = vector.load %arg10[%c0_74, %c0_75] : memref<2x128xf32, #tpu.memory_space<vmem>>, vector<2x128xf32>
    tpu.vector_store %arg10[%c0_74, %c0_75], %119 {strides = array<i32>} : memref<2x128xf32, #tpu.memory_space<vmem>>, vector<2x128xf32>,
    return
  }
  func.func @transform_0(%arg0: i32) -> (i32, i32) {
    %c0_i32 = arith.constant 0 : i32
    %c0_i32_0 = arith.constant 0 : i32
    return %arg0, %c0_i32 : i32, i32
  }
  func.func @transform_1(%arg0: i32) -> (i32, i32, i32) {
    %c0_i32 = arith.constant 0 : i32
    %c0_i32_0 = arith.constant 0 : i32
    %c0_i32_1 = arith.constant 0 : i32
    %c0_i32_2 = arith.constant 0 : i32
    return %c0_i32, %c0_i32_0, %c0_i32_1 : i32, i32, i32
  }
  func.func @transform_2(%arg0: i32) -> (i32, i32) {
    %c0_i32 = arith.constant 0 : i32
    %c0_i32_0 = arith.constant 0 : i32
    %c0_i32_1 = arith.constant 0 : i32
    return %c0_i32, %c0_i32_0 : i32, i32
  }
  func.func @transform_3(%arg0: i32) -> (i32, i32, i32) {
    %c0_i32 = arith.constant 0 : i32
    %c0_i32_0 = arith.constant 0 : i32
    %c0_i32_1 = arith.constant 0 : i32
    %c0_i32_2 = arith.constant 0 : i32
    return %c0_i32, %c0_i32_0, %c0_i32_1 : i32, i32, i32
  }
  func.func @transform_4(%arg0: i32) -> (i32, i32) {
    %c0_i32 = arith.constant 0 : i32
    %c0_i32_0 = arith.constant 0 : i32
    %c0_i32_1 = arith.constant 0 : i32
    return %c0_i32, %c0_i32_0 : i32, i32
  }
  func.func @transform_5(%arg0: i32) -> (i32, i32) {
    %c0_i32 = arith.constant 0 : i32
    %c0_i32_0 = arith.constant 0 : i32
    %c0_i32_1 = arith.constant 0 : i32
    return %c0_i32, %c0_i32_0 : i32, i32
  }
  func.func @transform_6(%arg0: i32) -> (i32, i32) {
    %c0_i32 = arith.constant 0 : i32
    %c0_i32_0 = arith.constant 0 : i32
    %c0_i32_1 = arith.constant 0 : i32
    return %c0_i32, %c0_i32_0 : i32, i32
  }
  func.func @transform_7(%arg0: i32) -> (i32, i32) {
    %c0_i32 = arith.constant 0 : i32
    %c0_i32_0 = arith.constant 0 : i32
    %c0_i32_1 = arith.constant 0 : i32
    return %c0_i32, %c0_i32_0 : i32, i32
  }
  func.func @transform_8(%arg0: i32) -> (i32, i32) {
    %c0_i32 = arith.constant 0 : i32
    %c0_i32_0 = arith.constant 0 : i32
    %c0_i32_1 = arith.constant 0 : i32
    return %c0_i32, %c0_i32_0 : i32, i32
  }
  func.func @transform_9(%arg0: i32) -> (i32, i32) {
    %c0_i32 = arith.constant 0 : i32
    %c0_i32_0 = arith.constant 0 : i32
    return %arg0, %c0_i32 : i32, i32
  }
}

</mosaic_0001>

<bundles_post_ra>
// kernel: conv_classifier_forward.1
= control target key start
LH: loop header
LB: loop body
LE: loop exit
PB: predicated region body
PF: predicated region fallthrough
CT: control target
= control target key end

     0   :  { %vm158_vm0 = vcmask 523264   ;;  %v33_v9 = vlaneseq  ;;  %s2680_s0 = inlined_call_operand.vmem [shape: f32[32,64], index: 0, kind: input, shape index: {}]   ;;  %s2681_s1 = inlined_call_operand.vmem [shape: f32[3,64,128], index: 1, kind: input, shape index: {}]   ;;  %s2682_s2 = inlined_call_operand.vmem [shape: f32[1,128], index: 2, kind: input, shape index: {}]   ;;  %s2683_s3 = inlined_call_operand.vmem [shape: f32[3,128,128], index: 3, kind: input, shape index: {}]   ;;  %s2684_s4 = inlined_call_operand.vmem [shape: f32[1,128], index: 4, kind: input, shape index: {}]   ;;  %s2685_s5 = inlined_call_operand.vmem [shape: f32[512,32], index: 5, kind: input, shape index: {}]   ;;  %s2686_s6 = inlined_call_operand.vmem [shape: f32[1,32], index: 6, kind: input, shape index: {}]   ;;  %s2687_s7 = inlined_call_operand.vmem [shape: f32[32,128], index: 7, kind: input, shape index: {}]   ;;  %s2688_s8 = inlined_call_operand.vmem [shape: f32[1,128], index: 8, kind: input, shape index: {}]   ;;  %s2689_s9 = inlined_call_operand.hbm [shape: f32[2,128], index: 9, kind: output, shape index: {}]  }
   0x1   :  { %v1314_v0 = vld [vmem:[%s2681_s1 + $0x40] sm:$0xff]  ;;  %v1315_v1 = vld [vmem:[%s2681_s1 + $0x48] sm:$0xff]  ;;  %v1316_v2 = vld [vmem:[%s2681_s1 + $0x50] sm:$0xff] }
   0x2   :  { %v1741_v3 = vpack.c.bf16 %v1315_v1, %v1314_v0  ;;  %v1317_v4 = vld [vmem:[%s2681_s1 + $0x58] sm:$0xff]  ;;  %v1318_v6 = vld [vmem:[%s2681_s1 + $0x60] sm:$0xff]  ;;  %v1319_v7 = vld [vmem:[%s2681_s1 + $0x68] sm:$0xff]  ;;  %v2089_v13 = vshrl.u32 %v33_v9, 7 }
   0x3   :  { %v1745_v5 = vpack.c.bf16 %v1317_v4, %v1316_v2  ;;  %v2079_v8 = vld [vmem:[%s2680_s0] sm:$0xff]  ;;  %v1749_v10 = vpack.c.bf16 %v1319_v7, %v1318_v6  ;;  %v1320_v11 = vld [vmem:[%s2681_s1 + $0x70] sm:$0xff]  ;;  %v1321_v12 = vld [vmem:[%s2681_s1 + $0x78] sm:$0xff] }
   0x4   :  { %1742 = vmatprep.subr.bf16.mxu0 %v1741_v3  ;;  %1566 = vmatprep.mubr.msk.f32.mxu0 %vm158_vm0, %v2079_v8  ;;  %v141_v14 = vld [vmem:[%s2681_s1] sm:$0xff]  ;;  %v1753_v15 = vpack.c.bf16 %v1321_v12, %v1320_v11  ;;  %v142_v16 = vld [vmem:[%s2681_s1 + $0x8] sm:$0xff]  ;;  %v2100_v17 = vld [vmem:[%s2680_s0 + $0x18] sm:$0xff]  ;;  %v42_v19 = vand.u32 15, %v2089_v13  ;;  %v115_v23 = vrot.slane %v2079_v8, 7  ;;  %vm119_vm2 = vcmp.lt.s32.totalorder %v2089_v13, 1 }
   0x5   :  { %1744 = vmatpush3.bf16.msra.mxu0 %v1741_v3  ;;  %v1343_v18 = vld [vmem:[%s2683_s3 + $0x80] sm:$0xff]  ;;  %v1344_v20 = vld [vmem:[%s2683_s3 + $0x88] sm:$0xff]  ;;  %v1345_v21 = vld [vmem:[%s2683_s3 + $0x90] sm:$0xff]  ;;  %v1757_v24 = vpack.c.bf16 %v142_v16, %v141_v14  ;;  %v118_v25 = vrot.slane %v2100_v17, 7 }
   0x6   :  { %1746 = vmatprep.subr.bf16.mxu0 %v1745_v5  ;;  %v1346_v22 = vld [vmem:[%s2683_s3 + $0x98] sm:$0xff]  ;;  %v1789_v26 = vpack.c.bf16 %v1344_v20, %v1343_v18  ;;  %v143_v28 = vld [vmem:[%s2681_s1 + $0x10] sm:$0xff]  ;;  %vm86_vm1 = vcmp.ge.s32.totalorder %v42_v19, 1 }
   0x7   :  { %v1793_v27 = vpack.c.bf16 %v1346_v22, %v1345_v21  ;;  %v144_v29 = vld [vmem:[%s2681_s1 + $0x18] sm:$0xff] }
   0x9   :  { %1748 = vmatpush3.bf16.msra.mxu0 %v1745_v5 }
   0xa   :  { %1750 = vmatprep.subr.bf16.mxu0 %v1749_v10 }
   0xd   :  { %1752 = vmatpush3.bf16.msra.mxu0 %v1749_v10 }
   0xe   :  { %1754 = vmatprep.subr.bf16.mxu0 %v1753_v15 }
   0xf   :  { %14 = vsyncpa [#allocation4], 0  ;;  %1790 = vmatprep.subr.bf16.mxu1 %v1789_v26  ;;  %v1347_v30 = vld [vmem:[%s2683_s3 + $0xa0] sm:$0xff]  ;;  %v1348_v31 = vld [vmem:[%s2683_s3 + $0xa8] sm:$0xff]  ;;  %v1761_v33 = vpack.c.bf16 %v144_v29, %v143_v28  ;;  %v2002_v35 = vmov 0.0   ;;  %v123_v37 = vsel %vm119_vm2, %v118_v25, %v115_v23  ;;  %v36_v40 = vadd.s32 16, %v2089_v13 }
  0x10   :  { %v2133_v32 = vld [vmem:[%s2680_s0 + $0x8] sm:$0xff]  ;;  %1792 = vmatpush3.bf16.msra.mxu1 %v1789_v26  ;;  %v2138_v34 = vld [vmem:[%s2680_s0 + $0x10] sm:$0xff]  ;;  %v2141_v36 = vsel %vm86_vm1, 1.0, %v2002_v35  ;;  %v145_v38 = vld [vmem:[%s2681_s1 + $0x20] sm:$0xff]  ;;  %v1797_v41 = vpack.c.bf16 %v1348_v31, %v1347_v30  ;;  %v128_v6 = vrot.slane %v2079_v8, 1  ;;  %v35_v9 = vadd.s32 8, %v2089_v13 }
  0x11   :  { %1756 = vmatpush3.bf16.msra.mxu0 %v1753_v15  ;;  %1794 = vmatprep.subr.bf16.mxu1 %v1793_v27  ;;  %v146_v39 = vld [vmem:[%s2681_s1 + $0x28] sm:$0xff]  ;;  %v1349_v42 = vld [vmem:[%s2683_s3 + $0xb0] sm:$0xff]  ;;  %v1350_v43 = vld [vmem:[%s2683_s3 + $0xb8] sm:$0xff]  ;;  %v124_v44 = vmul.f32 %v2141_v36, %v123_v37  ;;  %v56_v48 = vand.u32 15, %v36_v40  ;;  %v117_v52 = vrot.slane %v2138_v34, 7  ;;  %v116_v57 = vrot.slane %v2133_v32, 7 }
  0x12   :  { %1758 = vmatprep.subr.bf16.mxu0 %v1757_v24  ;;  %v1765_v45 = vpack.c.bf16 %v146_v39, %v145_v38  ;;  %v147_v46 = vld [vmem:[%s2681_s1 + $0x30] sm:$0xff]  ;;  %v148_v47 = vld [vmem:[%s2681_s1 + $0x38] sm:$0xff]  ;;  %v1801_v49 = vpack.c.bf16 %v1350_v43, %v1349_v42  ;;  %v1351_v50 = vld [vmem:[%s2683_s3 + $0xc0] sm:$0xff]  ;;  %v129_v7 = vrot.slane %v2133_v32, 1  ;;  %vm132_vm4 = vcmp.lt.s32.totalorder %v2089_v13, 7  ;;  %s2007_s0 = smov [#allocation3]  }
  0x13   :  { %v1352_v51 = vld [vmem:[%s2683_s3 + $0xc8] sm:$0xff]  ;;  %v1769_v53 = vpack.c.bf16 %v148_v47, %v147_v46  ;;  %v1330_v54 = vld [vmem:[%s2681_s1 + $0x80] sm:$0xff]  ;;  %vm88_vm3 = vcmp.ge.s32.totalorder %v56_v48, 1  ;;  %v1353_v58 = vld [vmem:[%s2683_s3 + $0xd0] sm:$0xff]  ;;  %v121_v62 = vsel %vm119_vm2, %v116_v57, %v117_v52  ;;  %v122_v4 = vsel %vm119_vm2, %v115_v23, %v116_v57  ;;  %s1302_s15 = sshll.u32 %s2007_s0, 4  ;;  %s1303_s15 = int_to_ptr.vmem [resolvable:$true] %s1302_s15 }
  0x14   :  { %1567 = vmatmul.mubr.msk.f32.vlgmr.msra.gmra.mrb[0].mxu0 %vm158_vm0, %v2133_v32  ;;  %1796 = vmatpush3.bf16.msra.mxu1 %v1793_v27  ;;  %v1331_v55 = vld [vmem:[%s2681_s1 + $0x88] sm:$0xff]  ;;  %v1805_v56 = vpack.c.bf16 %v1352_v51, %v1351_v50  ;;  %v1354_v59 = vld [vmem:[%s2683_s3 + $0xd8] sm:$0xff]  ;;  %v2197_v61 = vsel %vm88_vm3, 1.0, %v2002_v35  ;;  %v1332_v63 = vld [vmem:[%s2681_s1 + $0x90] sm:$0xff]  ;;  %v120_v8 = vsel %vm119_vm2, %v117_v52, %v118_v25  ;;  %v49_v15 = vand.u32 15, %v35_v9  ;;  %p1983_p1 = scmp.lt.s32.totalorder %s1303_s15, %s1303_s15 }
  0x15   :  { %1760 = vmatpush3.bf16.msra.mxu0 %v1757_v24  ;;  %1569 = vmatprep.mubr.msk.f32.mxu0 %vm158_vm0, %v2138_v34  ;;  %v1773_v60 = vpack.c.bf16 %v1331_v55, %v1330_v54  ;;  %v1333_v0 = vld [vmem:[%s2681_s1 + $0x98] sm:$0xff]  ;;  %v1809_v1 = vpack.c.bf16 %v1354_v59, %v1353_v58  ;;  %v1355_v2 = vld [vmem:[%s2683_s3 + $0xe0] sm:$0xff]  ;;  %v1356_v3 = vld [vmem:[%s2683_s3 + $0xe8] sm:$0xff]  ;;  %v126_v5 = vmul.f32 %v2197_v61, %v121_v62  ;;  %v37_v19 = vadd.s32 24, %v2089_v13 }
  0x16   :  { %1762 = vmatprep.subr.bf16.mxu0 %v1761_v33  ;;  %1798 = vmatprep.subr.bf16.mxu1 %v1797_v41  ;;  %v1777_v10 = vpack.c.bf16 %v1333_v0, %v1332_v63  ;;  %v1334_v11 = vld [vmem:[%s2681_s1 + $0xa0] sm:$0xff]  ;;  %v1335_v12 = vld [vmem:[%s2681_s1 + $0xa8] sm:$0xff]  ;;  %v1813_v14 = vpack.c.bf16 %v1356_v3, %v1355_v2  ;;  %v135_v18 = vsel %vm132_vm4, %v128_v6, %v129_v7  ;;  %v1336_v20 = vld [vmem:[%s2681_s1 + $0xb0] sm:$0xff]  ;;  %v130_v22 = vrot.slane %v2138_v34, 1 }
  0x17   :  { %v1781_v16 = vpack.c.bf16 %v1335_v12, %v1334_v11  ;;  %v1337_v21 = vld [vmem:[%s2681_s1 + $0xb8] sm:$0xff]  ;;  %vm99_vm5 = vcmp.le.s32.totalorder %v49_v15, 14  ;;  %v63_v24 = vand.u32 15, %v37_v19  ;;  %v131_v27 = vrot.slane %v2100_v17, 1  ;;  %v502_v37 = vld [vmem:[%s2683_s3] sm:$0xff]  ;;  %v503_v38 = vld [vmem:[%s2683_s3 + $0x8] sm:$0xff] }
  0x18   :  { %1570 = vmatmul.mubr.msk.f32.gmra.mrb[2].mxu0 %vm158_vm0, %v2100_v17  ;;  %1800 = vmatpush3.bf16.msra.mxu1 %v1797_v41  ;;  %v1785_v23 = vpack.c.bf16 %v1337_v21, %v1336_v20  ;;  %v2247_v25 = vsel %vm99_vm5, 1.0, %v2002_v35  ;;  %v134_v26 = vsel %vm132_vm4, %v129_v7, %v130_v22  ;;  %v1357_v17 = vld [vmem:[%s2683_s3 + $0xf0] sm:$0xff]  ;;  %v1821_v39 = vpack.c.bf16 %v503_v38, %v502_v37  ;;  %v1342_v40 = vld [vmem:[%s2682_s2] ss:$0 sm:$0xff]  ;;  %v505_v46 = vld [vmem:[%s2683_s3 + $0x18] sm:$0xff] }
  0x19   :  { %1764 = vmatpush3.bf16.msra.mxu0 %v1761_v33  ;;  %1588 = vmatprep.mubr.msk.f32.mxu0 %vm158_vm0, %v124_v44  ;;  %vm101_vm6 = vcmp.le.s32.totalorder %v63_v24, 14  ;;  %v138_v28 = vmul.f32 %v2247_v25, %v134_v26  ;;  %v136_v30 = vsel %vm132_vm4, %v131_v27, %v128_v6  ;;  %v133_v31 = vsel %vm132_vm4, %v130_v22, %v131_v27  ;;  %v1358_v33 = vld [vmem:[%s2683_s3 + $0xf8] sm:$0xff]  ;;  %v506_v58 = vld [vmem:[%s2683_s3 + $0x20] sm:$0xff]  ;;  %v507_v59 = vld [vmem:[%s2683_s3 + $0x28] sm:$0xff] }
  0x1a   :  { %1766 = vmatprep.subr.bf16.mxu0 %v1765_v45  ;;  %1802 = vmatprep.subr.bf16.mxu1 %v1801_v49  ;;  %v2254_v29 = vsel %vm101_vm6, 1.0, %v2002_v35  ;;  %v1817_v34 = vpack.c.bf16 %v1358_v33, %v1357_v17  ;;  %v1829_v3 = vpack.c.bf16 %v507_v59, %v506_v58  ;;  %v508_v6 = vld [vmem:[%s2683_s3 + $0x30] sm:$0xff]  ;;  %v509_v7 = vld [vmem:[%s2683_s3 + $0x38] sm:$0xff]  ;;  %v515_v24 = vld [vmem:[%s2683_s3 + $0x68] sm:$0xff]  ;;  %vm857_vm7 = vcmask 516096  }
  0x1b   :  { %v140_v32 = vmul.f32 %v2254_v29, %v136_v30  ;;  %v1833_v15 = vpack.c.bf16 %v509_v7, %v508_v6  ;;  %v512_v20 = vld [vmem:[%s2683_s3 + $0x50] sm:$0xff]  ;;  %v513_v21 = vld [vmem:[%s2683_s3 + $0x58] sm:$0xff]  ;;  %v1375_v58 = vld [vmem:[%s2684_s4] ss:$0 sm:$0xff]  ;;  %vm871_vm8 = vcmask 1040896   ;;  %vm2006_vm9 = vmmov 0  }
  0x1c   :  { %1804 = vmatpush3.bf16.msra.mxu1 %v1801_v49  ;;  %v1841_v22 = vpack.c.bf16 %v513_v21, %v512_v20  ;;  %v516_v27 = vld [vmem:[%s2683_s3 + $0x70] sm:$0xff]  ;;  %v993_v20 = vld [vmem:[%s2685_s5 + $0x88] sm:$0xff]  ;;  %v976_v21 = vld [vmem:[%s2685_s5] sm:$0xff]  ;;  %vm1221_vm10 = vcmask 261120  }
  0x1d   :  { %1768 = vmatpush3.bf16.msra.mxu0 %v1765_v45  ;;  %1806 = vmatprep.subr.bf16.mxu1 %v1805_v56  ;;  %v504_v45 = vld [vmem:[%s2683_s3 + $0x10] sm:$0xff] }
  0x1e   :  { %1770 = vmatprep.subr.bf16.mxu0 %v1769_v53  ;;  %v1825_v54 = vpack.c.bf16 %v505_v46, %v504_v45  ;;  %v1361_v33 = vld [vmem:[%s2683_s3 + $0x110] sm:$0xff]  ;;  %v1368_v45 = vld [vmem:[%s2683_s3 + $0x148] sm:$0xff] }
  0x20   :  { %1808 = vmatpush3.bf16.msra.mxu1 %v1805_v56 }
  0x21   :  { %1772 = vmatpush3.bf16.msra.mxu0 %v1769_v53  ;;  %1810 = vmatprep.subr.bf16.mxu1 %v1809_v1 }
  0x22   :  { %1774 = vmatprep.subr.bf16.mxu0 %v1773_v60 }
  0x24   :  { %1589 = vmatmul.mubr.msk.f32.vlgmr.msra.gmra.mrb[0].mxu0 %vm158_vm0, %v122_v4  ;;  %1812 = vmatpush3.bf16.msra.mxu1 %v1809_v1 }
  0x25   :  { %1776 = vmatpush3.bf16.msra.mxu0 %v1773_v60  ;;  %1591 = vmatprep.mubr.msk.f32.mxu0 %vm158_vm0, %v126_v5 }
  0x26   :  { %1778 = vmatprep.subr.bf16.mxu0 %v1777_v10  ;;  %1814 = vmatprep.subr.bf16.mxu1 %v1813_v14 }
  0x28   :  { %1592 = vmatmul.mubr.msk.f32.gmra.mrb[2].mxu0 %vm158_vm0, %v120_v8  ;;  %1816 = vmatpush3.bf16.msra.mxu1 %v1813_v14 }
  0x29   :  { %1780 = vmatpush3.bf16.msra.mxu0 %v1777_v10  ;;  %1610 = vmatprep.mubr.msk.f32.mxu0 %vm158_vm0, %v135_v18  ;;  %v510_v18 = vld [vmem:[%s2683_s3 + $0x40] sm:$0xff] }
  0x2a   :  { %1782 = vmatprep.subr.bf16.mxu0 %v1781_v16  ;;  %1818 = vmatprep.subr.bf16.mxu1 %v1817_v34 }
  0x2c   :  { %1820 = vmatpush3.bf16.msra.mxu1 %v1817_v34  ;;  %v1362_v34 = vld [vmem:[%s2683_s3 + $0x118] sm:$0xff] }
  0x2d   :  { %1784 = vmatpush3.bf16.msra.mxu0 %v1781_v16  ;;  %1822 = vmatprep.subr.bf16.mxu1 %v1821_v39  ;;  %v1857_v37 = vpack.c.bf16 %v1362_v34, %v1361_v33  ;;  %v996_v34 = vld [vmem:[%s2685_s5 + $0xa0] sm:$0xff] }
  0x2e   :  { %1786 = vmatprep.subr.bf16.mxu0 %v1785_v23 }
  0x31   :  { %1788 = vmatpush3.bf16.msra.mxu0 %v1785_v23  ;;  %v514_v23 = vld [vmem:[%s2683_s3 + $0x60] sm:$0xff] }
  0x32   :  { %v1845_v26 = vpack.c.bf16 %v515_v24, %v514_v23  ;;  %v977_v23 = vld [vmem:[%s2685_s5 + $0x8] sm:$0xff]  ;;  %v994_v24 = vld [vmem:[%s2685_s5 + $0x90] sm:$0xff] }
  0x34   :  { %1611 = vmatmul.mubr.msk.f32.vlgmr.msra.gmra.mrb[0].mxu0 %vm158_vm0, %v138_v28  ;;  %v517_v28 = vld [vmem:[%s2683_s3 + $0x78] sm:$0xff] }
  0x35   :  { %1613 = vmatprep.mubr.msk.f32.mxu0 %vm158_vm0, %v133_v31  ;;  %v1849_v30 = vpack.c.bf16 %v517_v28, %v516_v27  ;;  %v1359_v31 = vld [vmem:[%s2683_s3 + $0x100] sm:$0xff]  ;;  %v1887_v27 = vpack.c.bf16 %v977_v23, %v976_v21 }
  0x38   :  { %1614 = vmatmul.mubr.msk.f32.gmra.mrb[2].mxu0 %vm158_vm0, %v140_v32  ;;  %v1360_v32 = vld [vmem:[%s2683_s3 + $0x108] sm:$0xff] }
  0x39   :  { %v1853_v17 = vpack.c.bf16 %v1360_v32, %v1359_v31  ;;  %v979_v31 = vld [vmem:[%s2685_s5 + $0x18] sm:$0xff] }
 0x107   :  { %v1612_v41 = vpop.f32.mrb[0].mxu0 }
 0x108   :  { %v470_v42 = vadd.f32 %v1612_v41, %v1342_v40  ;;  %v440_v43 = vpop.f32.mrb[1].mxu0 }
 0x109   :  { %v469_v44 = vadd.f32 %v1342_v40, %v440_v43 }
 0x10a   :  { %v474_v47 = vmax.f32 %v470_v42, 0.0  ;;  %v1365_v42 = vld [vmem:[%s2683_s3 + $0x130] sm:$0xff] }
 0x10b   :  { %v473_v48 = vmax.f32 %v469_v44, 0.0  ;;  %v1615_v49 = vpop.f32.mrb[2].mxu0  ;;  %v1367_v44 = vld [vmem:[%s2683_s3 + $0x140] sm:$0xff] }
 0x10c   :  { %v479_v50 = vrot.slane %v474_v47, 7  ;;  %v491_v51 = vrot.slane %v474_v47, 1  ;;  %v472_v52 = vadd.f32 %v1615_v49, %v1342_v40  ;;  %v450_v53 = vpop.f32.mrb[3].mxu0  ;;  %v1869_v46 = vpack.c.bf16 %v1368_v45, %v1367_v44 }
 0x10d   :  { %v478_v55 = vrot.slane %v473_v48, 7  ;;  %v490_v56 = vrot.slane %v473_v48, 1  ;;  %v471_v57 = vadd.f32 %v1342_v40, %v450_v53  ;;  %1648 = vmatprep.mubr.f32.mxu1 %v473_v48  ;;  %v1364_v40 = vld [vmem:[%s2683_s3 + $0x128] sm:$0xff]  ;;  %v1370_v48 = vld [vmem:[%s2683_s3 + $0x158] sm:$0xff]  ;;  %v1373_v53 = vld [vmem:[%s2683_s3 + $0x170] sm:$0xff] }
 0x10e   :  { %v476_v60 = vmax.f32 %v472_v52, 0.0  ;;  %1649 = vmatmul.mubr.f32.vlgmr.msra.gmra.mrb[0].mxu1 %v474_v47  ;;  %v1369_v47 = vld [vmem:[%s2683_s3 + $0x150] sm:$0xff] }
 0x10f   :  { %v475_v62 = vmax.f32 %v471_v57, 0.0  ;;  %1824 = vmatpush3.bf16.msra.mxu1 %v1821_v39  ;;  %v484_v63 = vsel %vm119_vm2, %v478_v55, %v479_v50  ;;  %v2295_v0 = vsel %vm132_vm4, %v490_v56, %v491_v51  ;;  %v1363_v39 = vld [vmem:[%s2683_s3 + $0x120] sm:$0xff]  ;;  %v1873_v49 = vpack.c.bf16 %v1370_v48, %v1369_v47  ;;  %v983_v47 = vld [vmem:[%s2685_s5 + $0x38] sm:$0xff] }
 0x110   :  { %v481_v1 = vrot.slane %v476_v60, 7  ;;  %v493_v2 = vrot.slane %v476_v60, 1  ;;  %1826 = vmatprep.subr.bf16.mxu1 %v1825_v54  ;;  %v1861_v41 = vpack.c.bf16 %v1364_v40, %v1363_v39  ;;  %v980_v40 = vld [vmem:[%s2685_s5 + $0x20] sm:$0xff] }
 0x111   :  { %v480_v4 = vrot.slane %v475_v62, 7  ;;  %v492_v5 = vrot.slane %v475_v62, 1  ;;  %1651 = vmatprep.mubr.f32.mxu1 %v475_v62 }
 0x112   :  { %1652 = vmatmul.mubr.f32.gmra.mrb[2].mxu1 %v476_v60  ;;  %v485_v9 = vsel %vm119_vm2, %v481_v1, %v478_v55  ;;  %v2307_v10 = vsel %vm132_vm4, %v493_v2, %v490_v56 }
 0x113   :  { %v2311_v11 = vsel %vm132_vm4, %v491_v51, %v492_v5  ;;  %1828 = vmatpush3.bf16.msra.mxu1 %v1825_v54  ;;  %v486_v12 = vmul.f32 %v2141_v36, %v485_v9  ;;  %v483_v14 = vsel %vm119_vm2, %v479_v50, %v480_v4  ;;  %v482_v8 = vsel %vm119_vm2, %v480_v4, %v481_v1  ;;  %v511_v36 = vld [vmem:[%s2683_s3 + $0x48] sm:$0xff]  ;;  %v1371_v50 = vld [vmem:[%s2683_s3 + $0x160] sm:$0xff]  ;;  %v1374_v54 = vld [vmem:[%s2683_s3 + $0x178] sm:$0xff] }
 0x114   :  { %1830 = vmatprep.subr.bf16.mxu1 %v1829_v3  ;;  %v2320_v16 = vsel %vm132_vm4, %v492_v5, %v493_v2  ;;  %v1837_v19 = vpack.c.bf16 %v511_v36, %v510_v18  ;;  %v488_v38 = vmul.f32 %v2197_v61, %v483_v14  ;;  %v1366_v61 = vld [vmem:[%s2683_s3 + $0x138] sm:$0xff]  ;;  %v1372_v51 = vld [vmem:[%s2683_s3 + $0x168] sm:$0xff]  ;;  %v1881_v55 = vpack.c.bf16 %v1374_v54, %v1373_v53  ;;  %s2003_s3 = smov 64  }
 0x115   :  { %1686 = vmatprep.mubr.f32.mxu1 %v486_v12  ;;  %v1865_v43 = vpack.c.bf16 %v1366_v61, %v1365_v42  ;;  %v1877_v52 = vpack.c.bf16 %v1372_v51, %v1371_v50  ;;  %v499_v56 = vmul.f32 %v2247_v25, %v2311_v11  ;;  %v501_v57 = vmul.f32 %v2254_v29, %v2307_v10  ;;  %v998_v61 = vld [vmem:[%s2685_s5 + $0xb0] sm:$0xff]  ;;  %v1001_v51 = vld [vmem:[%s2685_s5 + $0xc8] sm:$0xff] }
 0x117   :  { %1832 = vmatpush3.bf16.msra.mxu1 %v1829_v3 }
 0x118   :  { %1834 = vmatprep.subr.bf16.mxu1 %v1833_v15 }
 0x11b   :  { %1836 = vmatpush3.bf16.msra.mxu1 %v1833_v15 }
 0x11c   :  { %1838 = vmatprep.subr.bf16.mxu1 %v1837_v19 }
 0x11f   :  { %1840 = vmatpush3.bf16.msra.mxu1 %v1837_v19  ;;  %v992_v19 = vld [vmem:[%s2685_s5 + $0x80] sm:$0xff] }
 0x120   :  { %1842 = vmatprep.subr.bf16.mxu1 %v1841_v22 }
 0x123   :  { %1844 = vmatpush3.bf16.msra.mxu1 %v1841_v22  ;;  %v1885_v22 = vpack.c.bf16 %v993_v20, %v992_v19  ;;  %v988_v19 = vld [vmem:[%s2685_s5 + $0x60] sm:$0xff]  ;;  %v989_v20 = vld [vmem:[%s2685_s5 + $0x68] sm:$0xff] }
 0x124   :  { %1846 = vmatprep.subr.bf16.mxu1 %v1845_v26 }
 0x125   :  { %1886 = vmatprep.subr.bf16.mxu0 %v1885_v22  ;;  %v1007_v22 = vld [vmem:[%s2685_s5 + $0xf8] sm:$0xff] }
 0x126   :  { %1888 = vmatpush3.bf16.msra.mxu0 %v1887_v27  ;;  %v1911_v27 = vpack.c.bf16 %v989_v20, %v988_v19 }
 0x127   :  { %1848 = vmatpush3.bf16.msra.mxu1 %v1845_v26  ;;  %v995_v26 = vld [vmem:[%s2685_s5 + $0x98] sm:$0xff] }
 0x128   :  { %1850 = vmatprep.subr.bf16.mxu1 %v1849_v30  ;;  %v1889_v28 = vpack.c.bf16 %v995_v26, %v994_v24 }
 0x12a   :  { %1890 = vmatprep.subr.bf16.mxu0 %v1889_v28 }
 0x12b   :  { %1852 = vmatpush3.bf16.msra.mxu1 %v1849_v30  ;;  %v978_v30 = vld [vmem:[%s2685_s5 + $0x10] sm:$0xff] }
 0x12c   :  { %1854 = vmatprep.subr.bf16.mxu1 %v1853_v17  ;;  %v1891_v32 = vpack.c.bf16 %v979_v31, %v978_v30 }
 0x12e   :  { %1687 = vmatmul.mubr.f32.vlgmr.msra.gmra.mrb[0].mxu1 %v484_v63  ;;  %1892 = vmatpush3.bf16.msra.mxu0 %v1891_v32  ;;  %v990_v32 = vld [vmem:[%s2685_s5 + $0x70] sm:$0xff] }
 0x12f   :  { %1689 = vmatprep.mubr.f32.mxu1 %v488_v38  ;;  %1856 = vmatpush3.bf16.msra.mxu1 %v1853_v17  ;;  %v2004_v17 = vmov 1983009808  }
 0x130   :  { %1858 = vmatprep.subr.bf16.mxu1 %v1857_v37  ;;  %v861_v33 = vunpack.c.l.s4 %v2004_v17  ;;  %v991_v17 = vld [vmem:[%s2685_s5 + $0x78] sm:$0xff] }
 0x132   :  { %1690 = vmatmul.mubr.f32.gmra.mrb[2].mxu1 %v482_v8  ;;  %v862_v38 = vunpack.c.0.s8 %v861_v33 }
 0x133   :  { %1860 = vmatpush3.bf16.msra.mxu1 %v1857_v37  ;;  %1724 = vmatprep.mubr.f32.mxu1 %v2295_v0  ;;  %v997_v37 = vld [vmem:[%s2685_s5 + $0xa8] sm:$0xff] }
 0x134   :  { %1862 = vmatprep.subr.bf16.mxu1 %v1861_v41  ;;  %v1893_v39 = vpack.c.bf16 %v997_v37, %v996_v34  ;;  %v2462_v44 = vsub.s32 %v862_v38, %v2089_v13  ;;  %v1000_v13 = vld [vmem:[%s2685_s5 + $0xc0] sm:$0xff]  ;;  %v1915_v34 = vpack.c.bf16 %v991_v17, %v990_v32 }
 0x135   :  { %v1901_v54 = vpack.c.bf16 %v1001_v51, %v1000_v13  ;;  %v1024_v38 = vld [vmem:[%s2685_s5 + $0x180] sm:$0xff]  ;;  %v1009_v51 = vld [vmem:[%s2685_s5 + $0x108] sm:$0xff] }
 0x136   :  { %1894 = vmatprep.subr.bf16.mxu0 %v1893_v39  ;;  %v1025_v39 = vld [vmem:[%s2685_s5 + $0x188] sm:$0xff]  ;;  %v1008_v13 = vld [vmem:[%s2685_s5 + $0x100] sm:$0xff] }
 0x137   :  { %1864 = vmatpush3.bf16.msra.mxu1 %v1861_v41  ;;  %v981_v41 = vld [vmem:[%s2685_s5 + $0x28] sm:$0xff] }
 0x138   :  { %1866 = vmatprep.subr.bf16.mxu1 %v1865_v43  ;;  %v1895_v42 = vpack.c.bf16 %v981_v41, %v980_v40  ;;  %v1917_v41 = vpack.c.bf16 %v1025_v39, %v1024_v38  ;;  %v2005_v38 = vmov 0.0|0.0   ;;  %v1210_v39 = vld [vmem:[%s2687_s7] sm:$0xff] }
 0x13a   :  { %1896 = vmatpush3.bf16.msra.mxu0 %v1895_v42 }
 0x13b   :  { %1868 = vmatpush3.bf16.msra.mxu1 %v1865_v43  ;;  %v999_v43 = vld [vmem:[%s2685_s5 + $0xb8] sm:$0xff] }
 0x13c   :  { %1870 = vmatprep.subr.bf16.mxu1 %v1869_v46  ;;  %v1897_v45 = vpack.c.bf16 %v999_v43, %v998_v61 }
 0x13e   :  { %1898 = vmatprep.subr.bf16.mxu0 %v1897_v45 }
 0x13f   :  { %1872 = vmatpush3.bf16.msra.mxu1 %v1869_v46  ;;  %v982_v46 = vld [vmem:[%s2685_s5 + $0x30] sm:$0xff] }
 0x140   :  { %1874 = vmatprep.subr.bf16.mxu1 %v1873_v49 }
 0x143   :  { %1876 = vmatpush3.bf16.msra.mxu1 %v1873_v49  ;;  %v1899_v49 = vpack.c.bf16 %v983_v47, %v982_v46 }
 0x144   :  { %1878 = vmatprep.subr.bf16.mxu1 %v1877_v52 }
 0x145   :  { %1900 = vmatpush3.bf16.msra.mxu0 %v1899_v49 }
 0x146   :  { %1902 = vmatprep.subr.bf16.mxu0 %v1901_v54  ;;  %v1026_v54 = vld [vmem:[%s2685_s5 + $0x190] sm:$0xff] }
 0x147   :  { %1880 = vmatpush3.bf16.msra.mxu1 %v1877_v52 }
 0x148   :  { %1882 = vmatprep.subr.bf16.mxu1 %v1881_v55 }
 0x14b   :  { %1884 = vmatpush3.bf16.msra.mxu1 %v1881_v55  ;;  %v984_v55 = vld [vmem:[%s2685_s5 + $0x40] sm:$0xff] }
 0x14c   :  { %1949 = vmatprep.subr.bf16.mxu1 %v2005_v38 }
 0x14e   :  { %1725 = vmatmul.mubr.f32.vlgmr.msra.gmra.mrb[0].mxu1 %v499_v56  ;;  %v985_v56 = vld [vmem:[%s2685_s5 + $0x48] sm:$0xff] }
 0x14f   :  { %1727 = vmatprep.mubr.f32.mxu1 %v2320_v16 }
 0x152   :  { %1728 = vmatmul.mubr.f32.gmra.mrb[2].mxu1 %v501_v57 }
 0x153   :  { %1738 = vmatprep.mubr.msk.f32.mxu1 %vm2006_vm9, %v2002_v35 }
 0x221   :  { %v1726_v59 = vpop.f32.mrb[0].mxu1 }
 0x222   :  { %v818_v60 = vadd.f32 %v1726_v59, %v1375_v58  ;;  %v788_v62 = vpop.f32.mrb[1].mxu1  ;;  %v1903_v59 = vpack.c.bf16 %v985_v56, %v984_v55  ;;  %v1027_v55 = vld [vmem:[%s2685_s5 + $0x198] sm:$0xff] }
 0x223   :  { %v817_v63 = vadd.f32 %v1375_v58, %v788_v62 }
 0x224   :  { %v822_v0 = vmax.f32 %v818_v60, 0.0  ;;  %1904 = vmatpush3.bf16.msra.mxu0 %v1903_v59  ;;  %v1921_v59 = vpack.c.bf16 %v1027_v55, %v1026_v54  ;;  %v1377_v54 = vld [vmem:[%s2688_s8] ss:$0 sm:$0xff] }
 0x225   :  { %v821_v1 = vmax.f32 %v817_v63, 0.0  ;;  %v1729_v2 = vpop.f32.mrb[2].mxu1 }
 0x226   :  { %v826_v3 = vrot.slane %v822_v0, 1  ;;  %v820_v25 = vadd.f32 %v1729_v2, %v1375_v58  ;;  %v798_v4 = vpop.f32.mrb[3].mxu1  ;;  %v1003_v2 = vld [vmem:[%s2685_s5 + $0xd8] sm:$0xff] }
 0x227   :  { %v825_v5 = vrot.slane %v821_v1, 1  ;;  %v819_v6 = vadd.f32 %v1375_v58, %v798_v4 }
 0x228   :  { %v824_v7 = vmax.f32 %v820_v25, 0.0 }
 0x229   :  { %v823_v9 = vmax.f32 %v819_v6, 0.0  ;;  %v831_v29 = vsel %vm132_vm4, %v825_v5, %v826_v3  ;;  %v986_v6 = vld [vmem:[%s2685_s5 + $0x50] sm:$0xff] }
 0x22a   :  { %v828_v10 = vrot.slane %v824_v7, 1  ;;  %v833_v11 = vmax.f32 %v821_v1, %v831_v29  ;;  %v1002_v1 = vld [vmem:[%s2685_s5 + $0xd0] sm:$0xff] }
 0x22b   :  { %v827_v12 = vrot.slane %v823_v9, 1 }
 0x22c   :  { %v832_v14 = vsel %vm132_vm4, %v828_v10, %v825_v5  ;;  %841 = vrot.lane.b32.xlu0 %v833_v11, %s2003_s3 }
 0x22d   :  { %v2409_v8 = vmax.f32 %v824_v7, %v832_v14  ;;  %v830_v15 = vsel %vm132_vm4, %v826_v3, %v827_v12  ;;  %v829_v16 = vsel %vm132_vm4, %v827_v12, %v828_v10  ;;  %v987_v7 = vld [vmem:[%s2685_s5 + $0x58] sm:$0xff]  ;;  %v1905_v10 = vpack.c.bf16 %v1003_v2, %v1002_v1  ;;  %v1004_v12 = vld [vmem:[%s2685_s5 + $0xe0] sm:$0xff]  ;;  %v1005_v14 = vld [vmem:[%s2685_s5 + $0xe8] sm:$0xff] }
 0x22e   :  { %v834_v18 = vmax.f32 %v822_v0, %v830_v15  ;;  %v835_v36 = vmax.f32 %v823_v9, %v829_v16  ;;  %v1909_v21 = vpack.c.bf16 %v1005_v14, %v1004_v12  ;;  %v1029_v1 = vld [vmem:[%s2685_s5 + $0x1a8] sm:$0xff] }
 0x22f   :  { %1906 = vmatprep.subr.bf16.mxu0 %v1905_v10  ;;  %v1032_v10 = vld [vmem:[%s2685_s5 + $0x1c0] sm:$0xff] }
 0x230   :  { %843 = vrot.lane.b32.xlu0 %v834_v18, %s2003_s3  ;;  %845 = vrot.lane.b32.xlu1 %v835_v36, %s2003_s3 }
 0x234   :  { %847 = vrot.lane.b32.xlu1 %v2409_v8, %s2003_s3 }
 0x29e   :  { %v842_v48 = vpop.permute.xlu0 %841 }
 0x29f   :  { %v853_v50 = vmax.f32 %v833_v11, %v842_v48  ;;  %v1907_v11 = vpack.c.bf16 %v987_v7, %v986_v6 }
 0x2a1   :  { %v873_v52 = vcombine.high %v853_v50, %v853_v50  ;;  %v866_v53 = vrot.slane %v853_v50, %v2462_v44  ;;  %858 = vst.msk [vmem:[#allocation2] sm:$0x1] %vm857_vm7, %v853_v50  ;;  %1908 = vmatpush3.bf16.msra.mxu0 %v1907_v11  ;;  %v1033_v11 = vld [vmem:[%s2685_s5 + $0x1c8] sm:$0xff] }
 0x2a2   :  { %v844_v57 = vpop.permute.xlu0 %843  ;;  %v846_v58 = vpop.permute.xlu1 %845  ;;  %1910 = vmatprep.subr.bf16.mxu0 %v1909_v21  ;;  %v1933_v14 = vpack.c.bf16 %v1033_v11, %v1032_v10  ;;  %v1018_v21 = vld [vmem:[%s2685_s5 + $0x150] sm:$0xff] }
 0x2a3   :  { %v854_v60 = vmax.f32 %v834_v18, %v844_v57  ;;  %v855_v62 = vmax.f32 %v835_v36, %v846_v58  ;;  %v867_v63 = vcombine.high %v866_v53, %v866_v53  ;;  %v880_v0 = vrot.slane %v873_v52, %v2462_v44 }
 0x2a4   :  { %v1919_v57 = vpack.c.bf16 %v1009_v51, %v1008_v13 }
 0x2a5   :  { %v902_v3 = vcombine.high %v854_v60, %v854_v60  ;;  %v931_v25 = vcombine.high %v855_v62, %v855_v62  ;;  %868 = vrot.lane.b32.xlu0 %v867_v63, %s2003_s3  ;;  %v883_v4 = vcombine.high %v880_v0, %v880_v0  ;;  %v896_v5 = vrot.slane %v854_v60, %v2462_v44 }
 0x2a6   :  { %882 = vst.msk [vmem:[#allocation2 + $0x2] sm:$0x1] %vm857_vm7, %v880_v0  ;;  %888 = vst.msk [vmem:[#allocation2 + $0x4] sm:$0x1] %vm857_vm7, %v854_v60  ;;  %v848_v9 = vpop.permute.xlu1 %847  ;;  %v925_v29 = vrot.slane %v855_v62, %v2462_v44  ;;  %1912 = vmatpush3.bf16.msra.mxu0 %v1911_v27  ;;  %v1010_v60 = vld [vmem:[%s2685_s5 + $0x110] sm:$0xff]  ;;  %v1028_v0 = vld [vmem:[%s2685_s5 + $0x1a0] sm:$0xff] }
 0x2a7   :  { %917 = vst.msk [vmem:[#allocation2 + $0x1] sm:$0x1] %vm857_vm7, %v855_v62  ;;  %v856_v15 = vmax.f32 %v2409_v8, %v848_v9  ;;  %884 = vrot.lane.b32.xlu1 %v883_v4, %s2003_s3  ;;  %v897_v16 = vcombine.high %v896_v5, %v896_v5  ;;  %v909_v18 = vrot.slane %v902_v3, %v2462_v44  ;;  %v1006_v8 = vld [vmem:[%s2685_s5 + $0xf0] sm:$0xff]  ;;  %v1011_v62 = vld [vmem:[%s2685_s5 + $0x118] sm:$0xff]  ;;  %v1012_v3 = vld [vmem:[%s2685_s5 + $0x120] sm:$0xff] }
 0x2a8   :  { %v938_v36 = vrot.slane %v931_v25, %v2462_v44  ;;  %v926_v26 = vcombine.high %v925_v29, %v925_v29  ;;  %v1913_v31 = vpack.c.bf16 %v1007_v22, %v1006_v8  ;;  %v1925_v2 = vpack.c.bf16 %v1029_v1, %v1028_v0  ;;  %v1013_v25 = vld [vmem:[%s2685_s5 + $0x128] sm:$0xff]  ;;  %v1030_v4 = vld [vmem:[%s2685_s5 + $0x1b0] sm:$0xff]  ;;  %v1031_v5 = vld [vmem:[%s2685_s5 + $0x1b8] sm:$0xff] }
 0x2a9   :  { %v960_v23 = vcombine.high %v856_v15, %v856_v15  ;;  %898 = vrot.lane.b32.xlu0 %v897_v16, %s2003_s3  ;;  %v912_v24 = vcombine.high %v909_v18, %v909_v18  ;;  %911 = vst.msk [vmem:[#allocation2 + $0x6] sm:$0x1] %vm857_vm7, %v909_v18  ;;  %946 = vst.msk [vmem:[#allocation2 + $0x5] sm:$0x1] %vm857_vm7, %v856_v15  ;;  %v954_v28 = vrot.slane %v856_v15, %v2462_v44  ;;  %v1014_v9 = vld [vmem:[%s2685_s5 + $0x130] sm:$0xff]  ;;  %v1015_v29 = vld [vmem:[%s2685_s5 + $0x138] sm:$0xff] }
 0x2aa   :  { %940 = vst.msk [vmem:[#allocation2 + $0x3] sm:$0x1] %vm857_vm7, %v938_v36  ;;  %v941_v33 = vcombine.high %v938_v36, %v938_v36  ;;  %1914 = vmatprep.subr.bf16.mxu0 %v1913_v31  ;;  %v1927_v6 = vpack.c.bf16 %v1013_v25, %v1012_v3  ;;  %v1929_v7 = vpack.c.bf16 %v1031_v5, %v1030_v4  ;;  %v1016_v15 = vld [vmem:[%s2685_s5 + $0x140] sm:$0xff]  ;;  %v1017_v16 = vld [vmem:[%s2685_s5 + $0x148] sm:$0xff]  ;;  %v1034_v18 = vld [vmem:[%s2685_s5 + $0x1d0] sm:$0xff] }
 0x2ab   :  { %913 = vrot.lane.b32.xlu1 %v912_v24, %s2003_s3  ;;  %v967_v30 = vrot.slane %v960_v23, %v2462_v44  ;;  %v955_v37 = vcombine.high %v954_v28, %v954_v28  ;;  %1916 = vmatpush3.bf16.msra.mxu0 %v1915_v34  ;;  %v1931_v12 = vpack.c.bf16 %v1015_v29, %v1014_v9  ;;  %v1035_v36 = vld [vmem:[%s2685_s5 + $0x1d8] sm:$0xff]  ;;  %v1036_v22 = vld [vmem:[%s2685_s5 + $0x1e0] sm:$0xff]  ;;  %v1037_v23 = vld [vmem:[%s2685_s5 + $0x1e8] sm:$0xff] }
 0x2ac   :  { %1918 = vmatprep.subr.bf16.mxu0 %v1917_v41  ;;  %v1935_v19 = vpack.c.bf16 %v1017_v16, %v1016_v15  ;;  %v1937_v20 = vpack.c.bf16 %v1035_v36, %v1034_v18  ;;  %v1019_v8 = vld [vmem:[%s2685_s5 + $0x158] sm:$0xff]  ;;  %v1020_v27 = vld [vmem:[%s2685_s5 + $0x160] sm:$0xff]  ;;  %v1021_v28 = vld [vmem:[%s2685_s5 + $0x168] sm:$0xff] }
 0x2ad   :  { %927 = vrot.lane.b32.xlu0 %v926_v26, %s2003_s3  ;;  %969 = vst.msk [vmem:[#allocation2 + $0x7] sm:$0x1] %vm857_vm7, %v967_v30  ;;  %v970_v40 = vcombine.high %v967_v30, %v967_v30  ;;  %v1939_v24 = vpack.c.bf16 %v1019_v8, %v1018_v21  ;;  %v1941_v26 = vpack.c.bf16 %v1037_v23, %v1036_v22  ;;  %v1038_v30 = vld [vmem:[%s2685_s5 + $0x1f0] sm:$0xff]  ;;  %v1039_v31 = vld [vmem:[%s2685_s5 + $0x1f8] sm:$0xff] }
 0x2ae   :  { %v1943_v32 = vpack.c.bf16 %v1021_v28, %v1020_v27  ;;  %v1945_v17 = vpack.c.bf16 %v1039_v31, %v1038_v30  ;;  %v1023_v34 = vld [vmem:[%s2685_s5 + $0x178] sm:$0xff] }
 0x2af   :  { %942 = vrot.lane.b32.xlu1 %v941_v33, %s2003_s3  ;;  %v1022_v33 = vld [vmem:[%s2685_s5 + $0x170] sm:$0xff] }
 0x2b1   :  { %956 = vrot.lane.b32.xlu0 %v955_v37, %s2003_s3  ;;  %v1947_v37 = vpack.c.bf16 %v1023_v34, %v1022_v33 }
 0x2b3   :  { %971 = vrot.lane.b32.xlu1 %v970_v40, %s2003_s3  ;;  %v1211_v40 = vld [vmem:[%s2687_s7 + $0x8] sm:$0xff] }
 0x2b4   :  { %v1950_v41 = vpack.c.bf16 %v1211_v40, %v1210_v39 }
 0x2b6   :  { %1951 = vmatpush3.bf16.msra.mxu1 %v1950_v41 }
 0x2b7   :  { %1952 = vmatprep.subr.bf16.mxu1 %v2005_v38 }
 0x317   :  { %v869_v42 = vpop.permute.xlu0 %868 }
 0x318   :  { %872 = vst.msk [vmem:[#allocation2] sm:$0x1] %vm871_vm8, %v869_v42  ;;  %v1212_v42 = vld [vmem:[%s2687_s7 + $0x10] sm:$0xff] }
 0x319   :  { %v885_v61 = vpop.permute.xlu1 %884 }
 0x31a   :  { %887 = vst.msk [vmem:[#allocation2 + $0x2] sm:$0x1] %vm871_vm8, %v885_v61  ;;  %v1213_v61 = vld [vmem:[%s2687_s7 + $0x18] sm:$0xff] }
 0x31b   :  { %v899_v43 = vpop.permute.xlu0 %898 }
 0x31c   :  { %901 = vst.msk [vmem:[#allocation2 + $0x4] sm:$0x1] %vm871_vm8, %v899_v43  ;;  %v1953_v43 = vpack.c.bf16 %v1213_v61, %v1212_v42 }
 0x31d   :  { %v914_v45 = vpop.permute.xlu1 %913 }
 0x31e   :  { %916 = vst.msk [vmem:[#allocation2 + $0x6] sm:$0x1] %vm871_vm8, %v914_v45  ;;  %1954 = vmatpush3.bf16.msra.mxu1 %v1953_v43 }
 0x31f   :  { %v928_v46 = vpop.permute.xlu0 %927 }
 0x320   :  { %930 = vst.msk [vmem:[#allocation2 + $0x1] sm:$0x1] %vm871_vm8, %v928_v46 }
 0x321   :  { %v943_v47 = vpop.permute.xlu1 %942 }
 0x322   :  { %945 = vst.msk [vmem:[#allocation2 + $0x3] sm:$0x1] %vm871_vm8, %v943_v47 }
 0x323   :  { %v957_v48 = vpop.permute.xlu0 %956 }
 0x324   :  { %959 = vst.msk [vmem:[#allocation2 + $0x5] sm:$0x1] %vm871_vm8, %v957_v48  ;;  %v1376_v48 = vld [vmem:[%s2686_s6] ss:$0 sm:$0xff]  ;;  %s1978_s6 = scalar_lea.vmem %s1303_s15, 32 }
 0x325   :  { %v972_v49 = vpop.permute.xlu1 %971  ;;  %p1979_p0 = scmp.ne.s32.totalorder %s1303_s15, %s1978_s6  ;;  %p1984_p2 = scmp.lt.s32.totalorder %s1978_s6, %s1978_s6 }
 0x326   :  { %974 = vst.msk [vmem:[#allocation2 + $0x7] sm:$0x1] %vm871_vm8, %v972_v49 }
 0x327   :  { %p1985_p3 = por %p1984_p2, %p1983_p1 }
 0x329   :  { %p1986_p4 = pnand %p1985_p3, %p1979_p0 }
 0x32d   :  { %v975_v50 = vld [vmem:[#allocation2] sm:$0xff] }
 0x32e   :  { %v1055_v52 = vrot.slane %v975_v50, %v2462_v44  ;;  %v1048_v53 = vcombine.high %v975_v50, %v975_v50 }
 0x330   :  { %v1063_v56 = vcombine.high %v1055_v52, %v1055_v52  ;;  %v1062_v58 = vrot.slane %v1048_v53, %v2462_v44  ;;  %v1923_v44 = vpack.c.bf16 %v1011_v62, %v1010_v60 }
 0x332   :  { %1133 = vmatprep.mubr.f32.mxu0 %v1063_v56  ;;  %v1064_v63 = vcombine.high %v1062_v58, %v1062_v58 }
 0x333   :  { %1134 = vmatmul.mubr.f32.vlgmr.msra.gmra.mrb[4].mxu0 %v1055_v52 }
 0x334   :  { %1920 = vmatpush3.bf16.msra.mxu0 %v1919_v57  ;;  %1203 = vmatprep.mubr.f32.mxu0 %v1064_v63 }
 0x335   :  { %1922 = vmatprep.subr.bf16.mxu0 %v1921_v59 }
 0x338   :  { %1924 = vmatpush3.bf16.msra.mxu0 %v1923_v44 }
 0x339   :  { %1926 = vmatprep.subr.bf16.mxu0 %v1925_v2 }
 0x33c   :  { %1928 = vmatpush3.bf16.msra.mxu0 %v1927_v6 }
 0x33d   :  { %1930 = vmatprep.subr.bf16.mxu0 %v1929_v7 }
 0x340   :  { %1932 = vmatpush3.bf16.msra.mxu0 %v1931_v12 }
 0x341   :  { %1934 = vmatprep.subr.bf16.mxu0 %v1933_v14 }
 0x344   :  { %1936 = vmatpush3.bf16.msra.mxu0 %v1935_v19 }
 0x345   :  { %1938 = vmatprep.subr.bf16.mxu0 %v1937_v20 }
 0x348   :  { %1940 = vmatpush3.bf16.msra.mxu0 %v1939_v24 }
 0x349   :  { %1942 = vmatprep.subr.bf16.mxu0 %v1941_v26 }
 0x34c   :  { %1944 = vmatpush3.bf16.msra.mxu0 %v1943_v32 }
 0x34d   :  { %1946 = vmatprep.subr.bf16.mxu0 %v1945_v17 }
 0x350   :  { %1948 = vmatpush3.bf16.msra.mxu0 %v1947_v37 }
 0x353   :  { %1204 = vmatmul.mubr.f32.vlgmr.msra.gmra.mrb[6].mxu0 %v1062_v58 }
 0x406   :  { %v1507_v45 = vpop.f32.mrb[4].mxu0 }
 0x407   :  { %v1508_v46 = vpop.f32.mrb[5].mxu0 }
 0x408   :  { %v1509_v47 = vadd.f32 %v1508_v46, %v1507_v45 }
 0x40a   :  { %v1136_v13 = vadd.f32 %v1509_v47, %v1376_v48 }
 0x426   :  { %v1542_v49 = vpop.f32.mrb[6].mxu0 }
 0x427   :  { %v1543_v50 = vpop.f32.mrb[7].mxu0 }
 0x428   :  { %v1544_v51 = vadd.f32 %v1543_v50, %v1542_v49 }
 0x42a   :  { %v1206_v52 = vadd.f32 %v1544_v51, %v1136_v13 }
 0x42c   :  { %v1209_v53 = vmax.f32 %v1206_v52, 0.0 }
 0x42e   :  { %1739 = vmatmul.mubr.msk.f32.vlgmr.msra.gmra.mrb[4].mxu1 %vm1221_vm10, %v1209_v53 }
 0x501   :  { %v1291_v35 = vpop.f32.mrb[4].mxu1 }
 0x502   :  { %v1292_v55 = vadd.f32 %v1377_v54, %v1291_v35  ;;  %v1740_v56 = vpop.f32.mrb[5].mxu1 }
 0x504   :  { %1295 = vst [vmem:[#allocation3] sm:$0x3] %v1292_v55 }
 0x505   :  { %1989 = shalt.err (!%p1986_p4)
}
 0x506   :  { %s1990_s18 = scalar_lea.hbm %s2689_s9, 32 }
 0x507   :  { %p1991_p5 = scmp.ne.s32.totalorder %s2689_s9, %s1990_s18  ;;  %p1994_p6 = scmp.lt.u32.totalorder %s1990_s18, %s2689_s9 }
 0x509   :  { %p1996_p7 = pnand %p1994_p6, %p1991_p5 }
 0x50b   :  { %1999 = shalt.err (!%p1996_p7)
}
 0x50c   :  { %1305 = dma.vmem_to_hbm [thread:$0]  %s1303_s15, 32, %s2689_s9, [#allocation4]  }
 0x50d   :  { %2000 = dma.done.wait [#allocation4], 32  }
 0x50e   :  { %2001 = vsyncadd [#allocation4], 4294967264 }
 0x50f   :  { %1309 = vsyncpa [#allocation4], 1 }

</bundles_post_ra>
